<compile_context>
chip_gen: v7x
topology: tpu7x:2x2x1
jax: 0.10.0
libtpu: 0.0.40
codegen_flags: <defaults>
</compile_context>

<pallas_src>
import functools

import jax
import jax.numpy as jnp
from jax.experimental import pallas as pl
from jax.experimental.pallas import tpu as pltpu


def _round_up(a, b):
    return ((a + b - 1) // b) * b


def _vmem_bytes(tn, tc, d_pad):
    # double-buffered f32 tiles: x, centres^T, 3x (1,tc) vectors, output
    per_step = tn * d_pad + d_pad * tc + 3 * tc + tn * tc
    return 2 * 4 * per_step


def _rbf_gaussian_kernel(x_ref, ct_ref, isig2_ref, a_ref, b_ref, o_ref):
    """One (tile_n, tile_c) output tile.

    x_ref    : (TN, Dp)  input rows (f32)
    ct_ref   : (Dp, TC)  centres, transposed once in the wrapper
    isig2_ref: (1, TC)   1/sigma^2
    a_ref    : (1, TC)   2/sigma^2
    b_ref    : (1, TC)   -||c||^2 / sigma^2
    o_ref    : (TN, TC)  output
    """
    x = x_ref[...]
    x_sq = jnp.sum(x * x, axis=-1, keepdims=True)                  # (TN, 1)  VPU
    # MXU contraction; ct may be bf16 (large-D option) with f32 accumulation.
    cross = jnp.dot(x.astype(ct_ref.dtype), ct_ref[...],
                    preferred_element_type=jnp.float32)             # (TN, TC)
    # -d2/sigma^2 = 2*cross/sigma^2 - x_sq/sigma^2 - ||c||^2/sigma^2
    arg = cross * a_ref[...] + (b_ref[...] - x_sq * isig2_ref[...])
    arg = jnp.minimum(arg, 0.0)            # clamp fp cancellation noise (d2 >= 0)
    o_ref[...] = jnp.exp(arg).astype(o_ref.dtype)                   # EUP


@functools.partial(
    jax.jit, static_argnames=("tile_n", "tile_c", "matmul_dtype", "out_dtype"))
def rbf_forward(x, centres, log_sigmas, *, tile_n=512, tile_c=512,
                matmul_dtype=jnp.float32, out_dtype=jnp.float32):
    """x: (N, D), centres: (C, D), log_sigmas: (C,)  ->  (N, C)."""
    N, D = x.shape
    C, D2 = centres.shape
    assert D == D2

    D_pad = _round_up(D, 8)

    # --- tile selection (multiples of 8 / 128, VMEM-budget aware) ------------
    tn = _round_up(min(tile_n, _round_up(N, 8)), 8)
    tc = min(_round_up(tile_c, 128), _round_up(C, 128))
    budget = 40 * 1024 * 1024          # headroom under the 48 MiB limit below
    while _vmem_bytes(tn, tc, D_pad) > budget and (tn > 256 or tc > 128):
        if tn > 256:
            tn //= 2
        else:
            tc //= 2
    N_pad = _round_up(N, tn)
    C_pad = _round_up(C, tc)

    # --- padding (zero pad: contributes nothing to dot / x_sq) ---------------
    x_p = x.astype(jnp.float32)
    if (N_pad, D_pad) != (N, D):
        x_p = jnp.pad(x_p, ((0, N_pad - N), (0, D_pad - D)))
    c_p = centres.astype(jnp.float32)
    ls_p = log_sigmas.astype(jnp.float32)
    if (C_pad, D_pad) != (C, D):
        c_p = jnp.pad(c_p, ((0, C_pad - C), (0, D_pad - D)))
        ls_p = jnp.pad(ls_p, (0, C_pad - C))   # sigma=1 for pad cols; sliced off

    # --- grid-invariant terms hoisted out of the kernel -----------------------
    c_sq = jnp.sum(c_p * c_p, axis=-1)                       # (C_pad,)
    isig2 = jnp.exp(-2.0 * ls_p)                             # 1/sigma^2
    a_vec = (2.0 * isig2).reshape(1, C_pad)
    b_vec = (-c_sq * isig2).reshape(1, C_pad)
    isig2 = isig2.reshape(1, C_pad)
    c_t = c_p.T.astype(matmul_dtype)                         # (D_pad, C_pad), one XLA transpose

    grid = (C_pad // tc, N_pad // tn)     # N innermost -> centres tile reused, no re-DMA

    cost = pl.CostEstimate(
        flops=2 * N_pad * C_pad * D_pad + 8 * N_pad * C_pad,
        transcendentals=N_pad * C_pad,
        bytes_accessed=4 * (N_pad * D_pad + D_pad * C_pad + 3 * C_pad)
        + N_pad * C_pad * jnp.dtype(out_dtype).itemsize,
    )

    out = pl.pallas_call(
        _rbf_gaussian_kernel,
        out_shape=jax.ShapeDtypeStruct((N_pad, C_pad), out_dtype),
        grid_spec=pltpu.PrefetchScalarGridSpec(
            num_scalar_prefetch=0,
            grid=grid,
            in_specs=[
                pl.BlockSpec((tn, D_pad), lambda j, i: (i, 0)),    # x tile
                pl.BlockSpec((D_pad, tc), lambda j, i: (0, j)),    # centres^T tile
                pl.BlockSpec((1, tc), lambda j, i: (0, j)),        # 1/sigma^2
                pl.BlockSpec((1, tc), lambda j, i: (0, j)),        # 2/sigma^2
                pl.BlockSpec((1, tc), lambda j, i: (0, j)),        # -||c||^2/sigma^2
            ],
            out_specs=pl.BlockSpec((tn, tc), lambda j, i: (i, j)),
        ),
        compiler_params=pltpu.CompilerParams(
            dimension_semantics=("parallel", "parallel"),
            vmem_limit_bytes=48 * 1024 * 1024,   # < v7x 64 MiB physical, raises v5e's 16 MiB default
        ),
        cost_estimate=cost,
    )(x_p, c_t, isig2, a_vec, b_vec)

    return out[:N, :C]


def rbf_reference(x, centres, log_sigmas):
    # Pure-JAX mirror of the PyTorch forward (gaussian basis).
    diff = x[:, None, :] - centres[None, :, :]
    dist = jnp.sqrt(jnp.sum(diff * diff, axis=-1)) / jnp.exp(log_sigmas)[None, :]
    return jnp.exp(-(dist ** 2))


# TODO(synk): only the gaussian basis_func is implemented in-kernel; other
# torch_rbf basis functions would swap the final exp(...) line of the kernel.

if __name__ == "__main__":
    key = jax.random.PRNGKey(0)
    k_x, k_c = jax.random.split(key)

    N, in_features, n_centres = 16, 32, 16

    x = jax.random.normal(k_x, (N, in_features), dtype=jnp.float32)
    # reset_parameters(): centres ~ N(0, 1), log_sigmas = 0
    centres = jax.random.normal(k_c, (n_centres, in_features), dtype=jnp.float32)
    log_sigmas = jnp.zeros((n_centres,), dtype=jnp.float32)

    out = rbf_forward(x, centres, log_sigmas)
    out = jax.block_until_ready(out)

    ref = rbf_reference(x, centres, log_sigmas)
    assert out.shape == (N, n_centres)
    assert jnp.allclose(out, ref, atol=1e-5, rtol=1e-5), "mismatch vs reference"

    print("KERNEL_OK")
</pallas_src>

<mosaic_0001>
module attributes {stable_mosaic.version = 11 : i64} {
  func.func @_rbf_gaussian_kernel(%arg0: i32, %arg1: i32, %arg2: memref<16x32xf32, #tpu.memory_space<vmem>>, %arg3: memref<32x128xf32, #tpu.memory_space<vmem>>, %arg4: memref<1x128xf32, #tpu.memory_space<vmem>>, %arg5: memref<1x128xf32, #tpu.memory_space<vmem>>, %arg6: memref<1x128xf32, #tpu.memory_space<vmem>>, %arg7: memref<16x128xf32, #tpu.memory_space<vmem>>) attributes {dimension_semantics = [#tpu.dimension_semantics<parallel>, #tpu.dimension_semantics<parallel>], iteration_bounds = array<i64: 1, 1>, scalar_prefetch = 0 : i64, scratch_operands = 0 : i64, tpu.core_type = #tpu.core_type<tc>, window_params = [{transform_indices = @transform_0, window_bounds = array<i64: 16, 32>}, {transform_indices = @transform_1, window_bounds = array<i64: 32, 128>}, {transform_indices = @transform_2, window_bounds = array<i64: 1, 128>}, {transform_indices = @transform_3, window_bounds = array<i64: 1, 128>}, {transform_indices = @transform_4, window_bounds = array<i64: 1, 128>}, {transform_indices = @transform_5, window_bounds = array<i64: 16, 128>}]} {
    %c0 = arith.constant 0 : index
    %c0_0 = arith.constant 0 : index
    %0 = vector.load %arg2[%c0, %c0_0] : memref<16x32xf32, #tpu.memory_space<vmem>>, vector<16x32xf32>
    %1 = arith.mulf %0, %0 : vector<16x32xf32>
    %cst = arith.constant dense<0.000000e+00> : vector<16xf32>
    %2 = vector.multi_reduction <add>, %1, %cst [1] : vector<16x32xf32> to vector<16xf32>
    %3 = vector.shape_cast %2 : vector<16xf32> to vector<16x1xf32>
    %c0_1 = arith.constant 0 : index
    %c0_2 = arith.constant 0 : index
    %4 = vector.load %arg3[%c0_1, %c0_2] : memref<32x128xf32, #tpu.memory_space<vmem>>, vector<32x128xf32>
    %cst_3 = arith.constant dense<0.000000e+00> : vector<16x128xf32>
    %5 = tpu.matmul %0, %4, %cst_3 {dimension_numbers = #tpu.dot_dimension_numbers<[1], [0], [0], [1], [0, 0, 1, 1], [], []>} : vector<16x32xf32>, vector<32x128xf32>, vector<16x128xf32> -> vector<16x128xf32>
    %c0_4 = arith.constant 0 : index
    %c0_5 = arith.constant 0 : index
    %6 = vector.load %arg5[%c0_4, %c0_5] : memref<1x128xf32, #tpu.memory_space<vmem>>, vector<1x128xf32>
    %7 = vector.broadcast %6 : vector<1x128xf32> to vector<16x128xf32>
    %8 = arith.mulf %5, %7 : vector<16x128xf32>
    %c0_6 = arith.constant 0 : index
    %c0_7 = arith.constant 0 : index
    %9 = vector.load %arg6[%c0_6, %c0_7] : memref<1x128xf32, #tpu.memory_space<vmem>>, vector<1x128xf32>
    %c0_8 = arith.constant 0 : index
    %c0_9 = arith.constant 0 : index
    %10 = vector.load %arg4[%c0_8, %c0_9] : memref<1x128xf32, #tpu.memory_space<vmem>>, vector<1x128xf32>
    %11 = vector.broadcast %3 : vector<16x1xf32> to vector<16x128xf32>
    %12 = vector.broadcast %10 : vector<1x128xf32> to vector<16x128xf32>
    %13 = arith.mulf %11, %12 : vector<16x128xf32>
    %14 = vector.broadcast %9 : vector<1x128xf32> to vector<16x128xf32>
    %15 = arith.subf %14, %13 : vector<16x128xf32>
    %16 = arith.addf %8, %15 : vector<16x128xf32>
    %cst_10 = arith.constant 0.000000e+00 : f32
    %17 = vector.broadcast %cst_10 : f32 to vector<16x128xf32>
    %18 = arith.minimumf %16, %17 : vector<16x128xf32>
    %19 = math.exp %18 : vector<16x128xf32>
    %c0_11 = arith.constant 0 : index
    %c0_12 = arith.constant 0 : index
    %20 = vector.load %arg7[%c0_11, %c0_12] : memref<16x128xf32, #tpu.memory_space<vmem>>, vector<16x128xf32>
    tpu.vector_store %arg7[%c0_11, %c0_12], %19 {strides = array<i32>} : memref<16x128xf32, #tpu.memory_space<vmem>>, vector<16x128xf32>,
    return
  }
  func.func @transform_0(%arg0: i32, %arg1: i32) -> (i32, i32) {
    %c0_i32 = arith.constant 0 : i32
    %c0_i32_0 = arith.constant 0 : i32
    return %arg1, %c0_i32 : i32, i32
  }
  func.func @transform_1(%arg0: i32, %arg1: i32) -> (i32, i32) {
    %c0_i32 = arith.constant 0 : i32
    %c0_i32_0 = arith.constant 0 : i32
    return %c0_i32, %arg0 : i32, i32
  }
  func.func @transform_2(%arg0: i32, %arg1: i32) -> (i32, i32) {
    %c0_i32 = arith.constant 0 : i32
    %c0_i32_0 = arith.constant 0 : i32
    return %c0_i32, %arg0 : i32, i32
  }
  func.func @transform_3(%arg0: i32, %arg1: i32) -> (i32, i32) {
    %c0_i32 = arith.constant 0 : i32
    %c0_i32_0 = arith.constant 0 : i32
    return %c0_i32, %arg0 : i32, i32
  }
  func.func @transform_4(%arg0: i32, %arg1: i32) -> (i32, i32) {
    %c0_i32 = arith.constant 0 : i32
    %c0_i32_0 = arith.constant 0 : i32
    return %c0_i32, %arg0 : i32, i32
  }
  func.func @transform_5(%arg0: i32, %arg1: i32) -> (i32, i32) {
    %c0_i32 = arith.constant 0 : i32
    return %arg1, %arg0 : i32, i32
  }
}

</mosaic_0001>

<bundles_post_ra>
// kernel: rbf_forward.1
= control target key start
LH: loop header
LB: loop body
LE: loop exit
PB: predicated region body
PF: predicated region fallthrough
CT: control target
= control target key end

     0   :  { %vm25_vm0 = vcmask 261120   ;;  %s307_s0 = inlined_call_operand.vmem [shape: f32[16,32], index: 0, kind: input, shape index: {}]   ;;  %s308_s1 = inlined_call_operand.vmem [shape: f32[32,128], index: 1, kind: input, shape index: {}]   ;;  %s309_s2 = inlined_call_operand.vmem [shape: f32[1,128], index: 2, kind: input, shape index: {}]   ;;  %s310_s3 = inlined_call_operand.vmem [shape: f32[1,128], index: 3, kind: input, shape index: {}]   ;;  %s311_s4 = inlined_call_operand.vmem [shape: f32[1,128], index: 4, kind: input, shape index: {}]   ;;  %s312_s5 = inlined_call_operand.hbm [shape: f32[16,128], index: 5, kind: output, shape index: {}]  }
   0x1   :  { %v32_v0 = vld [vmem:[%s308_s1] sm:$0xff]  ;;  %v33_v1 = vld [vmem:[%s308_s1 + $0x8] sm:$0xff]  ;;  %v34_v2 = vld [vmem:[%s308_s1 + $0x10] sm:$0xff] }
   0x2   :  { %v192_v3 = vpack.c.bf16 %v33_v1, %v32_v0  ;;  %v35_v4 = vld [vmem:[%s308_s1 + $0x18] sm:$0xff]  ;;  %v21_v5 = vld [vmem:[%s307_s0] sm:$0xff]  ;;  %v22_v6 = vld [vmem:[%s307_s0 + $0x8] sm:$0xff] }
   0x3   :  { %v196_v7 = vpack.c.bf16 %v35_v4, %v34_v2  ;;  %v23_v8 = vmul.f32 %v21_v5, %v21_v5  ;;  %189 = vmatprep.mubr.msk.f32.mxu0 %vm25_vm0, %v21_v5  ;;  %v24_v9 = vmul.f32 %v22_v6, %v22_v6 }
   0x4   :  { %10 = vsyncpa [#allocation3], 0  ;;  %193 = vmatprep.subr.bf16.mxu0 %v192_v3  ;;  %v173_v14 = vld [vmem:[%s309_s2] ss:$0 sm:$0xff]  ;;  %s231_s2 = smov [#allocation2]  }
   0x5   :  { %195 = vmatpush3.bf16.msra.mxu0 %v192_v3  ;;  %v26_v10 = vsel %vm25_vm0, %v23_v8, 0.0  ;;  %v29_v11 = vsel %vm25_vm0, %v24_v9, 0.0  ;;  %v174_v16 = vld [vmem:[%s311_s4] ss:$0 sm:$0xff]  ;;  %s159_s4 = sshll.u32 %s231_s2, 4  ;;  %s160_s4 = int_to_ptr.vmem [resolvable:$true] %s159_s4 }
   0x6   :  { %197 = vmatprep.subr.bf16.mxu0 %v196_v7  ;;  %27 = vadd.xlane.f32.xlu0 %v26_v10  ;;  %v172_v18 = vld [vmem:[%s310_s3] ss:$0 sm:$0xff]  ;;  %s207_s3 = scalar_lea.vmem %s160_s4, 256  ;;  %p212_p1 = scmp.lt.s32.totalorder %s160_s4, %s160_s4 }
   0x7   :  { %p208_p0 = scmp.ne.s32.totalorder %s160_s4, %s207_s3  ;;  %p213_p2 = scmp.lt.s32.totalorder %s207_s3, %s207_s3 }
   0x9   :  { %199 = vmatpush3.bf16.msra.mxu0 %v196_v7  ;;  %p214_p3 = por %p213_p2, %p212_p1 }
   0xa   :  { %30 = vadd.xlane.f32.xlu0 %v29_v11 }
   0xb   :  { %p215_p4 = pnand %p214_p3, %p208_p0 }
   0xc   :  { %190 = vmatmul.mubr.msk.f32.vlgmr.msra.gmra.mrb[0].mxu0 %vm25_vm0, %v22_v6 }
  0x93   :  { %v28_v12 = vpop.xlane.xlu0 %27 }
  0x94   :  { %v134_v17 = vmul.f32 %v173_v14, %v28_v12 }
  0x96   :  { %v142_v23 = vsub.f32 %v174_v16, %v134_v17 }
  0x97   :  { %v31_v13 = vpop.xlane.xlu0 %30 }
  0x98   :  { %v135_v15 = vmul.f32 %v173_v14, %v31_v13 }
  0x9a   :  { %v143_v19 = vsub.f32 %v174_v16, %v135_v15 }
  0xdf   :  { %v191_v20 = vpop.f32.mrb[0].mxu0 }
  0xe0   :  { %v125_v21 = vmul.f32 %v191_v20, %v172_v18  ;;  %v108_v22 = vpop.f32.mrb[1].mxu0 }
  0xe1   :  { %v124_v24 = vmul.f32 %v172_v18, %v108_v22 }
  0xe2   :  { %v145_v25 = vadd.f32 %v143_v19, %v125_v21 }
  0xe3   :  { %v144_v26 = vadd.f32 %v142_v23, %v124_v24 }
  0xe4   :  { %v147_v27 = vmin.f32 %v145_v25, 0.0 }
  0xe5   :  { %v146_v28 = vmin.f32 %v144_v26, 0.0 }
  0xe6   :  { %v150_v29 = vmul.f32 1.442695, %v147_v27 }
  0xe7   :  { %v148_v30 = vmul.f32 1.442695, %v146_v28 }
  0xe8   :  { %203 = vpow2.f32 %v150_v29 }
  0xe9   :  { %205 = vpow2.f32 %v148_v30 }
  0xf2   :  { %v204_v31 = vpop.eup %203 }
  0xf3   :  { %v206_v32 = vpop.eup %205  ;;  %153 = vst [vmem:[#allocation2 + $0x8] sm:$0xff] %v204_v31 }
  0xf4   :  { %152 = vst [vmem:[#allocation2] sm:$0xff] %v206_v32 }
  0xf5   :  { %218 = shalt.err (!%p215_p4)
}
  0xf6   :  { %s219_s11 = scalar_lea.hbm %s312_s5, 256 }
  0xf7   :  { %p220_p5 = scmp.ne.s32.totalorder %s312_s5, %s219_s11  ;;  %p223_p6 = scmp.lt.u32.totalorder %s219_s11, %s312_s5 }
  0xf9   :  { %p225_p7 = pnand %p223_p6, %p220_p5 }
  0xfb   :  { %228 = shalt.err (!%p225_p7)
}
  0xfc   :  { %s232_s16 = smov 128   ;;  %s233_s17 = smov 8  }
  0xfd   :  { %165 = dma.vmem_to_hbm [thread:$0]  %s160_s4, 256, %s312_s5, [#allocation3], %s232_s16, %s232_s16, %s233_s17  }
  0xfe   :  { %229 = dma.done.wait [#allocation3], 256  }
  0xff   :  { %230 = vsyncadd [#allocation3], 4294967040 }
 0x100   :  { %169 = vsyncpa [#allocation3], 1 }

</bundles_post_ra>
